<compile_context>
chip_gen: v6e
topology: v6e:2x2x1
jax: 0.10.0
libtpu: 0.0.40
codegen_flags: <defaults>
</compile_context>

<pallas_src>
import jax
import jax.numpy as jnp
from jax.experimental import pallas as pl
from jax.experimental.pallas import tpu as pltpu


# ----------------------------------------------------------------------------
# Pallas kernel
# ----------------------------------------------------------------------------
def _round_up(x, m):
    return ((x + m - 1) // m) * m


def _conv1x1_kernel(x_ref, w_ref, b_ref, o_ref):
    """o[0] = f32(w @ x[0]) + b  (bias broadcast over the lane dim)."""
    acc = jnp.dot(w_ref[...], x_ref[0],
                  preferred_element_type=jnp.float32)       # (Cout, thw) f32
    o_ref[0] = (acc + b_ref[...]).astype(o_ref.dtype)


def _choose_hw_tile(cin, cout, hw, in_itemsize, out_itemsize, vmem_budget):
    """Largest multiple-of-128 H*W tile whose double-buffered blocks fit budget."""
    hw_padded = _round_up(hw, 128)
    # bytes per lane column: double-buffered input block + output block
    per_col = 2 * (cin * in_itemsize + cout * out_itemsize)
    max_cols = max(vmem_budget // per_col, 128)
    thw = min(hw_padded, (max_cols // 128) * 128)
    return max(thw, 128)


def feature_map_block(x_nchw, weight, bias, *, compute_dtype=jnp.bfloat16,
                      vmem_budget_bytes=8 * 1024 * 1024):
    """nn.Conv2d(Cin, Cout, kernel_size=1) forward on NCHW input.

    x_nchw: (N, Cin, H, W) float32
    weight: (Cout, Cin, 1, 1) (or (Cout, Cin)) ; bias: (Cout,)
    Returns (N, Cout, H, W) float32.
    """
    N, Cin, H, W = x_nchw.shape
    Cout = weight.shape[0]
    HW = H * W

    w = weight.reshape(Cout, Cin).astype(compute_dtype)
    b = bias.reshape(Cout, 1).astype(jnp.float32)
    x = x_nchw.reshape(N, Cin, HW).astype(compute_dtype)    # free reshape (row-major)

    in_sz = jnp.dtype(compute_dtype).itemsize
    thw = _choose_hw_tile(Cin, Cout, HW, in_sz, 4, vmem_budget_bytes)
    HWp = _round_up(HW, thw)
    if HWp != HW:
        x = jnp.pad(x, ((0, 0), (0, 0), (0, HWp - HW)))

    out = pl.pallas_call(
        _conv1x1_kernel,
        out_shape=jax.ShapeDtypeStruct((N, Cout, HWp), jnp.float32),
        grid=(N, HWp // thw),
        in_specs=[
            pl.BlockSpec((1, Cin, thw), lambda n, j: (n, 0, j)),   # activations
            pl.BlockSpec((Cout, Cin), lambda n, j: (0, 0)),        # weights (whole)
            pl.BlockSpec((Cout, 1), lambda n, j: (0, 0)),          # bias (whole)
        ],
        out_specs=pl.BlockSpec((1, Cout, thw), lambda n, j: (n, 0, j)),
        compiler_params=pltpu.CompilerParams(
            dimension_semantics=("parallel", "parallel"),
            vmem_limit_bytes=32 * 1024 * 1024,
        ),
    )(x, w, b)

    return out[:, :, :HW].reshape(N, Cout, H, W)


# ----------------------------------------------------------------------------
# Parameter init (matches nn.Conv2d default: uniform +/- 1/sqrt(fan_in))
# ----------------------------------------------------------------------------
def init_feature_map_block_params(key, input_channels, output_channels):
    kw, kb = jax.random.split(key)
    scale = 1.0 / (float(input_channels) ** 0.5)
    weight = jax.random.uniform(kw, (output_channels, input_channels, 1, 1),
                                jnp.float32, -scale, scale)
    bias = jax.random.uniform(kb, (output_channels,), jnp.float32, -scale, scale)
    return weight, bias


# ----------------------------------------------------------------------------
if __name__ == "__main__":
    key = jax.random.PRNGKey(0)
    k_params, k_x = jax.random.split(key)

    batch, input_channels, output_channels, H, W = 2, 4, 8, 16, 16
    weight, bias = init_feature_map_block_params(k_params, input_channels,
                                                 output_channels)
    x = jax.random.normal(k_x, (batch, input_channels, H, W), jnp.float32)

    fwd = jax.jit(feature_map_block)
    out = jax.block_until_ready(fwd(x, weight, bias))

    assert out.shape == (batch, output_channels, H, W), out.shape
    assert jnp.all(jnp.isfinite(out))

    # Reference with the same bf16-cast operands (isolates kernel logic from the
    # intentional bf16 MXU rounding requested by the performance review).
    w_ref = weight.reshape(output_channels, input_channels)
    w_ref = w_ref.astype(jnp.bfloat16).astype(jnp.float32)
    x_ref = x.astype(jnp.bfloat16).astype(jnp.float32)
    ref = jnp.einsum("oc,nchw->nohw", w_ref, x_ref,
                     precision=jax.lax.Precision.HIGHEST)
    ref = ref + bias[None, :, None, None]
    max_err = float(jnp.max(jnp.abs(out - ref)))
    assert max_err < 1e-3, max_err

    print("KERNEL_OK")
</pallas_src>

<mosaic_0001>
module attributes {stable_mosaic.version = 11 : i64} {
  func.func @_conv1x1_kernel(%arg0: i32, %arg1: i32, %arg2: memref<1x4x256xbf16, #tpu.memory_space<vmem>>, %arg3: memref<8x4xbf16, #tpu.memory_space<vmem>>, %arg4: memref<8x1xf32, #tpu.memory_space<vmem>>, %arg5: memref<1x8x256xf32, #tpu.memory_space<vmem>>) attributes {dimension_semantics = [#tpu.dimension_semantics<parallel>, #tpu.dimension_semantics<parallel>], iteration_bounds = array<i64: 2, 1>, scalar_prefetch = 0 : i64, scratch_operands = 0 : i64, tpu.core_type = #tpu.core_type<tc>, window_params = [{transform_indices = @transform_0, window_bounds = array<i64: 1, 4, 256>}, {pipeline_mode = #tpu.pipeline_mode<synchronous>, transform_indices = @transform_1, window_bounds = array<i64: 8, 4>}, {pipeline_mode = #tpu.pipeline_mode<synchronous>, transform_indices = @transform_2, window_bounds = array<i64: 8, 1>}, {transform_indices = @transform_3, window_bounds = array<i64: 1, 8, 256>}]} {
    %c0 = arith.constant 0 : index
    %c0_0 = arith.constant 0 : index
    %0 = vector.load %arg3[%c0, %c0_0] : memref<8x4xbf16, #tpu.memory_space<vmem>>, vector<8x4xbf16>
    %c0_1 = arith.constant 0 : index
    %c0_2 = arith.constant 0 : index
    %c0_3 = arith.constant 0 : index
    %1 = vector.load %arg2[%c0_1, %c0_2, %c0_3] : memref<1x4x256xbf16, #tpu.memory_space<vmem>>, vector<1x4x256xbf16>
    %2 = vector.shape_cast %1 : vector<1x4x256xbf16> to vector<4x256xbf16>
    %cst = arith.constant dense<0.000000e+00> : vector<8x256xf32>
    %3 = tpu.matmul %0, %2, %cst {dimension_numbers = #tpu.dot_dimension_numbers<[1], [0], [0], [1], [0, 0, 1, 1], [], []>} : vector<8x4xbf16>, vector<4x256xbf16>, vector<8x256xf32> -> vector<8x256xf32>
    %c0_4 = arith.constant 0 : index
    %c0_5 = arith.constant 0 : index
    %4 = vector.load %arg4[%c0_4, %c0_5] : memref<8x1xf32, #tpu.memory_space<vmem>>, vector<8x1xf32>
    %5 = vector.broadcast %4 : vector<8x1xf32> to vector<8x256xf32>
    %6 = arith.addf %3, %5 : vector<8x256xf32>
    %c0_6 = arith.constant 0 : index
    %c0_7 = arith.constant 0 : index
    %c0_8 = arith.constant 0 : index
    %7 = vector.load %arg5[%c0_6, %c0_7, %c0_8] : memref<1x8x256xf32, #tpu.memory_space<vmem>>, vector<1x8x256xf32>
    %8 = vector.shape_cast %7 : vector<1x8x256xf32> to vector<8x256xf32>
    %9 = vector.shape_cast %6 : vector<8x256xf32> to vector<1x8x256xf32>
    tpu.vector_store %arg5[%c0_6, %c0_7, %c0_8], %9 {strides = array<i32>} : memref<1x8x256xf32, #tpu.memory_space<vmem>>, vector<1x8x256xf32>,
    return
  }
  func.func @transform_0(%arg0: i32, %arg1: i32) -> (i32, i32, i32) {
    %c0_i32 = arith.constant 0 : i32
    %c0_i32_0 = arith.constant 0 : i32
    return %arg0, %c0_i32, %arg1 : i32, i32, i32
  }
  func.func @transform_1(%arg0: i32, %arg1: i32) -> (i32, i32) {
    %c0_i32 = arith.constant 0 : i32
    %c0_i32_0 = arith.constant 0 : i32
    %c0_i32_1 = arith.constant 0 : i32
    return %c0_i32, %c0_i32_0 : i32, i32
  }
  func.func @transform_2(%arg0: i32, %arg1: i32) -> (i32, i32) {
    %c0_i32 = arith.constant 0 : i32
    %c0_i32_0 = arith.constant 0 : i32
    %c0_i32_1 = arith.constant 0 : i32
    return %c0_i32, %c0_i32_0 : i32, i32
  }
  func.func @transform_3(%arg0: i32, %arg1: i32) -> (i32, i32, i32) {
    %c0_i32 = arith.constant 0 : i32
    %c0_i32_0 = arith.constant 0 : i32
    return %arg0, %c0_i32, %arg1 : i32, i32, i32
  }
}

</mosaic_0001>

<bundles_post_ra>
// kernel: feature_map_block.1
= control target key start
LH: loop header
LB: loop body
LE: loop exit
PB: predicated region body
PF: predicated region fallthrough
CT: control target
= control target key end

     0   :  { %s456_s12 = smov 0   ;;  %s458_s13 = smov 0   ;;  %s495_s0 = inlined_call_operand.vmem [shape: bf16[2,4,256], index: 0, kind: input, shape index: {}]   ;;  %s496_s1 = inlined_call_operand.vmem [shape: bf16[8,4], index: 1, kind: input, shape index: {}]   ;;  %s497_s2 = inlined_call_operand.vmem [shape: f32[8,1], index: 2, kind: input, shape index: {}]   ;;  %s498_s3 = inlined_call_operand.vmem [shape: f32[2,8,256], index: 3, kind: output, shape index: {}]  }
   0x1   :  { %s460_s14 = smov 0  }
   0x2 LB: > { %s25_s15 = sadd.s32 1, %s429_s13  ;;  %p373_p0 = scmp.ge.s32.totalorder %s433_s14, 1  ;;  %s433_s14 = sphi %s460_s14, %s13_s14   ;;  %s429_s13 = sphi %s458_s13, %s500_s13   ;;  %s425_s12 = sphi %s456_s12, %s499_s12  }
   0x3   : > { %p27_p1 = scmp.ge.s32.totalorder %s25_s15, 2  ;;  %p158_p2 = scmp.lt.s32.totalorder %s433_s14, 3 }
   0x5   : > { %s502_s15 = smov (%p27_p1, %s25_s15), 0  ;;  %p159_p3 = pnand %p373_p0, %p158_p2 }
   0x6   : > { %p191_p4 = scmp.lt.s32.totalorder (!%p159_p3), %s425_s12, 1 }
   0x7   : > { %162 = sbr.rel (%p159_p3) target bundleno = 221 (0xdd), region = 32 }
   0xc   : > { %v435_v0 = vmov 0   ;;  %v213_v1 = vld [vmem:[%s497_s2] sm:$0xff]  ;;  %s504_s12 = smov (!%p191_p4, %s425_s12), 1  ;;  %vm232_vm0 = vcmask 1041408   ;;  %vm228_vm1 = vcmask 31744  }
   0xd   : > { %271 = vmatprep.mubr.bf16.mxu0 %v435_v0  ;;  %410 = vset.pattern.permute.xlu0 %v435_v0  ;;  %s383_s18 = sshll.u32 %s504_s12, 2  ;;  %v211_v5 = vld [vmem:[%s496_s1] sm:$0xf]  ;;  %s384_s24 = sshll.u32 %s504_s12, 4 }
   0xe   : > { %216 = vperm.xlu0 %410, %v213_v1   ;;  %s198_s21 = scalar_lea.vmem %s495_s0, %s383_s18  ;;  %s208_s27 = scalar_lea.vmem %s498_s3, %s384_s24 }
   0xf   : > { %v378_v2 = vld.sshfl [vmem:[%s198_s21] sm:$0x33 pattern:$0x76325410] }
  0x10   : > { %v227_v3 = vcombine.high %v378_v2, %v378_v2  ;;  %v234_v4 = vsel %vm232_vm0, %v378_v2, 0 }
  0x12   : > { %379 = vmatprep.subr.msk.bf16.mxu0 %vm232_vm0, %v227_v3 }
  0x13   : > { %254 = vmatpush1.bf16.msra.mxu0 %v234_v4 }
  0x16   : > { %380 = vmatmul.mubr.msk.bf16.vlgmr.msra.gmra.mxu0 %vm228_vm1, %v211_v5 }
  0x89   : > { %v217_v6 = vpop.permute.xlu0 %216 }
  0xd6   : > { %v273_v7 = vpop.f32.mrf.mxu0 }
  0xd7   : > { %v274_v8 = vadd.f32 %v273_v7, %v217_v6 }
  0xd8   : > { %v275_v9 = vpop.f32.mrf.mxu0 }
  0xd9   : > { %280 = vst [vmem:[%s208_s27] sm:$0xff] %v274_v8  ;;  %v276_v10 = vadd.f32 %v275_v9, %v217_v6 }
  0xda   : > { %v277_v11 = vpop.f32.mrf.mxu0 }
  0xdb   : > { %281 = vst [vmem:[%s208_s27 + $0x8] sm:$0xff] %v276_v10 }
  0xdc   : > { %v278_v12 = vpop.f32.mrf.mxu0 }
  0xdd PF: > { %s13_s14 = sadd.s32 1, %s433_s14   ;;  %s499_s12 = smov %s429_s13 }
  0xde   : > { %p10_p5 = scmp.ge.s32.totalorder %s13_s14, 4   ;;  %s500_s13 = smov %s502_s15 }
  0xe0   :  { %12 = sbr.rel (!%p10_p5) target bundleno = 2 (0x2), region = 62 }

</bundles_post_ra>
